<compile_context>
chip_gen: v6e
topology: v6e:2x2x1
jax: 0.10.0
libtpu: 0.0.40
codegen_flags: <defaults>
</compile_context>

<pallas_src>
import functools

import jax
import jax.numpy as jnp
from jax import lax
from jax.experimental import pallas as pl
from jax.experimental.pallas import tpu as pltpu

EPS = 1e-5  # nn.GroupNorm default eps


# ---------------- in-kernel helpers (traced inside the Pallas body) ----------------
def _group_norm_relu(x, gamma, beta, groups):
    """x: (C, HW) f32, gamma/beta: (C, 1) f32. GroupNorm over (C/G, HW) + ReLU."""
    c, hw = x.shape
    cpg = c // groups
    xg = x.reshape(groups, cpg * hw)                 # identity when cpg == 1
    n = jnp.float32(cpg * hw)
    mean = jnp.sum(xg, axis=1, keepdims=True) / n                      # (G, 1)
    ex2 = jnp.sum(xg * xg, axis=1, keepdims=True) / n                  # (G, 1)
    var = jnp.maximum(ex2 - mean * mean, 0.0)        # clamp: E[x^2]-mean^2 can cancel
    inv = lax.rsqrt(var + EPS)
    xn = ((xg - mean) * inv).reshape(c, hw)                            # (C, HW)
    return jnp.maximum(xn * gamma + beta, 0.0)


def _conv3x3_im2col(act, w2d, masks, width):
    """act: (Cin, HW) f32, w2d: (Cout, 9*Cin) bf16, masks: (9, HW) f32.

    3x3 conv, stride 1, pad 1, computed as a single MXU matmul:
        out = w2d @ patches,  patches[k*Cin + c, p] = act[c, p + dh*W + dw] * mask_k[p]
    Lane rotations give the shifted taps; masks zero the positions where the
    true conv input would be padding.
    """
    c, hw = act.shape
    taps = []
    k = 0
    for dh in (-1, 0, 1):
        for dw in (-1, 0, 1):
            off = (dh * width + dw) % hw
            if off == 0:
                rolled = act
            else:
                # rolled[:, p] = act[:, (p + off) mod hw]  (lane rotation)
                rolled = jnp.concatenate([act[:, off:], act[:, :off]], axis=1)
            if dh == 0 and dw == 0:
                taps.append(rolled)                  # center tap: mask is all-ones
            else:
                taps.append(rolled * masks[k:k + 1, :])
            k += 1
    patches = jnp.concatenate(taps, axis=0).astype(jnp.bfloat16)       # (9*Cin, HW)
    return jnp.dot(w2d, patches, preferred_element_type=jnp.float32)   # (Cout, HW) f32


# ---------------- Pallas kernel: whole ResBlock for one batch element ----------------
def resblock_kernel(x_ref, m_ref, g1_ref, b1_ref, w1_ref, g2_ref, b2_ref, w2_ref,
                    o_ref, *, groups1, groups2, width):
    x = x_ref[...].astype(jnp.float32)               # (Cin, HW) f32
    masks = m_ref[...]                               # (9, HW) f32

    # norm1 + relu
    y = _group_norm_relu(x, g1_ref[...], b1_ref[...], groups1)
    # conv1 (stride=1, pad=1, no bias)
    y = _conv3x3_im2col(y, w1_ref[...], masks, width)                  # (Cout, HW)
    # norm2 + relu
    y = _group_norm_relu(y, g2_ref[...], b2_ref[...], groups2)
    # conv2
    y = _conv3x3_im2col(y, w2_ref[...], masks, width)                  # (Cout, HW)
    # residual add (downsample=None -> shortcut = x, requires Cin == Cout)
    o_ref[...] = (y + x).astype(o_ref.dtype)


# ---------------- wrapper: layout glue, weight repacking, boundary masks ----------------
def resblock_forward(x_nchw, params):
    g1, b1, w1, g2, b2, w2 = params                  # PyTorch-convention shapes
    n, cin, h, w = x_nchw.shape
    cout = w1.shape[0]
    assert cin == cout, "downsample=None requires inplanes == planes"
    groups1 = min(32, cin)
    groups2 = min(32, cout)
    assert cin % groups1 == 0 and cout % groups2 == 0, "GroupNorm needs C % groups == 0"
    hw = h * w

    x = x_nchw.reshape(n, cin, hw)                   # spatial flattened onto lane axis

    # boundary masks for the 9 taps (1 where the shifted input is in-bounds)
    ii = jnp.arange(hw, dtype=jnp.int32) // w
    jj = jnp.arange(hw, dtype=jnp.int32) % w
    mlist = []
    for dh in (-1, 0, 1):
        for dw in (-1, 0, 1):
            mlist.append((ii + dh >= 0) & (ii + dh < h) & (jj + dw >= 0) & (jj + dw < w))
    masks = jnp.stack(mlist, axis=0).astype(jnp.float32)               # (9, HW)

    # conv weight (Cout, Cin, 3, 3) -> (Cout, 9*Cin), tap-major / channel-minor, bf16
    w1r = jnp.transpose(w1, (0, 2, 3, 1)).reshape(cout, 9 * cin).astype(jnp.bfloat16)
    w2r = jnp.transpose(w2, (0, 2, 3, 1)).reshape(cout, 9 * cout).astype(jnp.bfloat16)

    kernel = functools.partial(resblock_kernel, groups1=groups1, groups2=groups2, width=w)
    out = pl.pallas_call(
        kernel,
        out_shape=jax.ShapeDtypeStruct((n, cout, hw), x_nchw.dtype),
        grid_spec=pltpu.PrefetchScalarGridSpec(
            num_scalar_prefetch=0,
            grid=(n,),
            in_specs=[
                pl.BlockSpec((pl.Squeezed(), cin, hw), lambda i: (i, 0, 0)),   # x
                pl.BlockSpec((9, hw), lambda i: (0, 0)),                       # masks
                pl.BlockSpec((cin, 1), lambda i: (0, 0)),                      # gamma1
                pl.BlockSpec((cin, 1), lambda i: (0, 0)),                      # beta1
                pl.BlockSpec((cout, 9 * cin), lambda i: (0, 0)),               # w1
                pl.BlockSpec((cout, 1), lambda i: (0, 0)),                     # gamma2
                pl.BlockSpec((cout, 1), lambda i: (0, 0)),                     # beta2
                pl.BlockSpec((cout, 9 * cout), lambda i: (0, 0)),              # w2
            ],
            out_specs=pl.BlockSpec((pl.Squeezed(), cout, hw), lambda i: (i, 0, 0)),
        ),
        compiler_params=pltpu.CompilerParams(dimension_semantics=("parallel",)),
    )(x, masks, g1.reshape(cin, 1), b1.reshape(cin, 1), w1r,
      g2.reshape(cout, 1), b2.reshape(cout, 1), w2r)
    return out.reshape(n, cout, h, w)                # back to NCHW


# ---------------- pure-JAX reference (for correctness check) ----------------
def resblock_reference(x, params):
    g1, b1, w1, g2, b2, w2 = params

    def gn(v, gamma, beta, groups):
        nb, c, hh, ww = v.shape
        vr = v.reshape(nb, groups, c // groups, hh, ww)
        mean = vr.mean(axis=(2, 3, 4), keepdims=True)
        var = vr.var(axis=(2, 3, 4), keepdims=True)
        vn = ((vr - mean) / jnp.sqrt(var + EPS)).reshape(nb, c, hh, ww)
        return vn * gamma.reshape(1, c, 1, 1) + beta.reshape(1, c, 1, 1)

    def conv(v, w):
        return lax.conv_general_dilated(v, w, (1, 1), ((1, 1), (1, 1)),
                                        dimension_numbers=('NCHW', 'OIHW', 'NCHW'))

    out = jax.nn.relu(gn(x, g1, b1, min(32, x.shape[1])))
    out = conv(out, w1)
    out = jax.nn.relu(gn(out, g2, b2, min(32, w1.shape[0])))
    out = conv(out, w2)
    return out + x


if __name__ == "__main__":
    N, C, H, W = 2, 4, 16, 16          # inplanes = planes = 4, stride = 1, no downsample
    key = jax.random.PRNGKey(0)
    kx, k1, k2, k3, k4, k5, k6 = jax.random.split(key, 7)

    x = jax.random.normal(kx, (N, C, H, W), jnp.float32)
    # deterministic, non-trivial parameter init (shapes per the module's __init__)
    g1 = 1.0 + 0.1 * jax.random.normal(k1, (C,), jnp.float32)   # norm1.weight
    b1 = 0.1 * jax.random.normal(k2, (C,), jnp.float32)         # norm1.bias
    w1 = 0.2 * jax.random.normal(k3, (C, C, 3, 3), jnp.float32) # conv1.weight (no bias)
    g2 = 1.0 + 0.1 * jax.random.normal(k4, (C,), jnp.float32)   # norm2.weight
    b2 = 0.1 * jax.random.normal(k5, (C,), jnp.float32)         # norm2.bias
    w2 = 0.2 * jax.random.normal(k6, (C, C, 3, 3), jnp.float32) # conv2.weight (no bias)
    params = (g1, b1, w1, g2, b2, w2)

    out = jax.block_until_ready(resblock_forward(x, params))
    ref = jax.block_until_ready(resblock_reference(x, params))

    assert out.shape == (N, C, H, W) and out.dtype == jnp.float32
    # tolerance loosened vs the f32 reference because conv matmul operands are bf16
    # (f32 accumulation); expected max abs err is ~1e-2.
    max_err = jnp.max(jnp.abs(out - ref))
    assert jnp.allclose(out, ref, rtol=3e-2, atol=3e-2), f"max abs err {max_err}"
    print("KERNEL_OK")
</pallas_src>

<mosaic_0001>
module attributes {stable_mosaic.version = 11 : i64} {
  func.func @resblock_kernel(%arg0: i32, %arg1: memref<1x4x256xf32, #tpu.memory_space<vmem>>, %arg2: memref<9x256xf32, #tpu.memory_space<vmem>>, %arg3: memref<4x1xf32, #tpu.memory_space<vmem>>, %arg4: memref<4x1xf32, #tpu.memory_space<vmem>>, %arg5: memref<4x36xbf16, #tpu.memory_space<vmem>>, %arg6: memref<4x1xf32, #tpu.memory_space<vmem>>, %arg7: memref<4x1xf32, #tpu.memory_space<vmem>>, %arg8: memref<4x36xbf16, #tpu.memory_space<vmem>>, %arg9: memref<1x4x256xf32, #tpu.memory_space<vmem>>) attributes {dimension_semantics = [#tpu.dimension_semantics<parallel>], iteration_bounds = array<i64: 2>, scalar_prefetch = 0 : i64, scratch_operands = 0 : i64, tpu.core_type = #tpu.core_type<tc>, window_params = [{transform_indices = @transform_0, window_bounds = array<i64: 1, 4, 256>}, {pipeline_mode = #tpu.pipeline_mode<synchronous>, transform_indices = @transform_1, window_bounds = array<i64: 9, 256>}, {pipeline_mode = #tpu.pipeline_mode<synchronous>, transform_indices = @transform_2, window_bounds = array<i64: 4, 1>}, {pipeline_mode = #tpu.pipeline_mode<synchronous>, transform_indices = @transform_3, window_bounds = array<i64: 4, 1>}, {pipeline_mode = #tpu.pipeline_mode<synchronous>, transform_indices = @transform_4, window_bounds = array<i64: 4, 36>}, {pipeline_mode = #tpu.pipeline_mode<synchronous>, transform_indices = @transform_5, window_bounds = array<i64: 4, 1>}, {pipeline_mode = #tpu.pipeline_mode<synchronous>, transform_indices = @transform_6, window_bounds = array<i64: 4, 1>}, {pipeline_mode = #tpu.pipeline_mode<synchronous>, transform_indices = @transform_7, window_bounds = array<i64: 4, 36>}, {transform_indices = @transform_8, window_bounds = array<i64: 1, 4, 256>}]} {
    %c0 = arith.constant 0 : index
    %c0_0 = arith.constant 0 : index
    %c0_1 = arith.constant 0 : index
    %0 = vector.load %arg1[%c0, %c0_0, %c0_1] : memref<1x4x256xf32, #tpu.memory_space<vmem>>, vector<1x4x256xf32>
    %1 = vector.shape_cast %0 : vector<1x4x256xf32> to vector<4x256xf32>
    %c0_2 = arith.constant 0 : index
    %c0_3 = arith.constant 0 : index
    %2 = vector.load %arg2[%c0_2, %c0_3] : memref<9x256xf32, #tpu.memory_space<vmem>>, vector<9x256xf32>
    %c0_4 = arith.constant 0 : index
    %c0_5 = arith.constant 0 : index
    %3 = vector.load %arg3[%c0_4, %c0_5] : memref<4x1xf32, #tpu.memory_space<vmem>>, vector<4x1xf32>
    %c0_6 = arith.constant 0 : index
    %c0_7 = arith.constant 0 : index
    %4 = vector.load %arg4[%c0_6, %c0_7] : memref<4x1xf32, #tpu.memory_space<vmem>>, vector<4x1xf32>
    %cst = arith.constant dense<0.000000e+00> : vector<4xf32>
    %5 = vector.multi_reduction <add>, %1, %cst [1] : vector<4x256xf32> to vector<4xf32>
    %6 = vector.shape_cast %5 : vector<4xf32> to vector<4x1xf32>
    %cst_8 = arith.constant 2.560000e+02 : f32
    %7 = vector.broadcast %cst_8 : f32 to vector<4x1xf32>
    %8 = arith.divf %6, %7 : vector<4x1xf32>
    %9 = arith.mulf %1, %1 : vector<4x256xf32>
    %cst_9 = arith.constant dense<0.000000e+00> : vector<4xf32>
    %10 = vector.multi_reduction <add>, %9, %cst_9 [1] : vector<4x256xf32> to vector<4xf32>
    %11 = vector.shape_cast %10 : vector<4xf32> to vector<4x1xf32>
    %cst_10 = arith.constant 2.560000e+02 : f32
    %12 = vector.broadcast %cst_10 : f32 to vector<4x1xf32>
    %13 = arith.divf %11, %12 : vector<4x1xf32>
    %14 = arith.mulf %8, %8 : vector<4x1xf32>
    %15 = arith.subf %13, %14 : vector<4x1xf32>
    %cst_11 = arith.constant 0.000000e+00 : f32
    %16 = vector.broadcast %cst_11 : f32 to vector<4x1xf32>
    %17 = arith.maximumf %15, %16 : vector<4x1xf32>
    %cst_12 = arith.constant 9.99999974E-6 : f32
    %18 = vector.broadcast %cst_12 : f32 to vector<4x1xf32>
    %19 = arith.addf %17, %18 : vector<4x1xf32>
    %20 = math.rsqrt %19 : vector<4x1xf32>
    %21 = vector.broadcast %8 : vector<4x1xf32> to vector<4x256xf32>
    %22 = arith.subf %1, %21 : vector<4x256xf32>
    %23 = vector.broadcast %20 : vector<4x1xf32> to vector<4x256xf32>
    %24 = arith.mulf %22, %23 : vector<4x256xf32>
    %25 = vector.broadcast %3 : vector<4x1xf32> to vector<4x256xf32>
    %26 = arith.mulf %24, %25 : vector<4x256xf32>
    %27 = vector.broadcast %4 : vector<4x1xf32> to vector<4x256xf32>
    %28 = arith.addf %26, %27 : vector<4x256xf32>
    %cst_13 = arith.constant 0.000000e+00 : f32
    %29 = vector.broadcast %cst_13 : f32 to vector<4x256xf32>
    %30 = arith.maximumf %28, %29 : vector<4x256xf32>
    %c0_14 = arith.constant 0 : index
    %c0_15 = arith.constant 0 : index
    %31 = vector.load %arg5[%c0_14, %c0_15] : memref<4x36xbf16, #tpu.memory_space<vmem>>, vector<4x36xbf16>
    %32 = vector.extract_strided_slice %30 {offsets = [0, 239], sizes = [4, 17], strides = [1, 1]} : vector<4x256xf32> to vector<4x17xf32>
    %33 = vector.extract_strided_slice %30 {offsets = [0, 0], sizes = [4, 239], strides = [1, 1]} : vector<4x256xf32> to vector<4x239xf32>
    %34 = tpu.concatenate %32, %33 in 1 : vector<4x17xf32>, vector<4x239xf32> -> vector<4x256xf32>
    %35 = vector.extract_strided_slice %2 {offsets = [0, 0], sizes = [1, 256], strides = [1, 1]} : vector<9x256xf32> to vector<1x256xf32>
    %36 = vector.broadcast %35 : vector<1x256xf32> to vector<4x256xf32>
    %37 = arith.mulf %34, %36 : vector<4x256xf32>
    %38 = vector.extract_strided_slice %30 {offsets = [0, 240], sizes = [4, 16], strides = [1, 1]} : vector<4x256xf32> to vector<4x16xf32>
    %39 = vector.extract_strided_slice %30 {offsets = [0, 0], sizes = [4, 240], strides = [1, 1]} : vector<4x256xf32> to vector<4x240xf32>
    %40 = tpu.concatenate %38, %39 in 1 : vector<4x16xf32>, vector<4x240xf32> -> vector<4x256xf32>
    %41 = vector.extract_strided_slice %2 {offsets = [1, 0], sizes = [1, 256], strides = [1, 1]} : vector<9x256xf32> to vector<1x256xf32>
    %42 = vector.broadcast %41 : vector<1x256xf32> to vector<4x256xf32>
    %43 = arith.mulf %40, %42 : vector<4x256xf32>
    %44 = vector.extract_strided_slice %30 {offsets = [0, 241], sizes = [4, 15], strides = [1, 1]} : vector<4x256xf32> to vector<4x15xf32>
    %45 = vector.extract_strided_slice %30 {offsets = [0, 0], sizes = [4, 241], strides = [1, 1]} : vector<4x256xf32> to vector<4x241xf32>
    %46 = tpu.concatenate %44, %45 in 1 : vector<4x15xf32>, vector<4x241xf32> -> vector<4x256xf32>
    %47 = vector.extract_strided_slice %2 {offsets = [2, 0], sizes = [1, 256], strides = [1, 1]} : vector<9x256xf32> to vector<1x256xf32>
    %48 = vector.broadcast %47 : vector<1x256xf32> to vector<4x256xf32>
    %49 = arith.mulf %46, %48 : vector<4x256xf32>
    %50 = vector.extract_strided_slice %30 {offsets = [0, 255], sizes = [4, 1], strides = [1, 1]} : vector<4x256xf32> to vector<4x1xf32>
    %51 = vector.extract_strided_slice %30 {offsets = [0, 0], sizes = [4, 255], strides = [1, 1]} : vector<4x256xf32> to vector<4x255xf32>
    %52 = tpu.concatenate %50, %51 in 1 : vector<4x1xf32>, vector<4x255xf32> -> vector<4x256xf32>
    %53 = vector.extract_strided_slice %2 {offsets = [3, 0], sizes = [1, 256], strides = [1, 1]} : vector<9x256xf32> to vector<1x256xf32>
    %54 = vector.broadcast %53 : vector<1x256xf32> to vector<4x256xf32>
    %55 = arith.mulf %52, %54 : vector<4x256xf32>
    %56 = vector.extract_strided_slice %30 {offsets = [0, 1], sizes = [4, 255], strides = [1, 1]} : vector<4x256xf32> to vector<4x255xf32>
    %57 = vector.extract_strided_slice %30 {offsets = [0, 0], sizes = [4, 1], strides = [1, 1]} : vector<4x256xf32> to vector<4x1xf32>
    %58 = tpu.concatenate %56, %57 in 1 : vector<4x255xf32>, vector<4x1xf32> -> vector<4x256xf32>
    %59 = vector.extract_strided_slice %2 {offsets = [5, 0], sizes = [1, 256], strides = [1, 1]} : vector<9x256xf32> to vector<1x256xf32>
    %60 = vector.broadcast %59 : vector<1x256xf32> to vector<4x256xf32>
    %61 = arith.mulf %58, %60 : vector<4x256xf32>
    %62 = vector.extract_strided_slice %30 {offsets = [0, 15], sizes = [4, 241], strides = [1, 1]} : vector<4x256xf32> to vector<4x241xf32>
    %63 = vector.extract_strided_slice %30 {offsets = [0, 0], sizes = [4, 15], strides = [1, 1]} : vector<4x256xf32> to vector<4x15xf32>
    %64 = tpu.concatenate %62, %63 in 1 : vector<4x241xf32>, vector<4x15xf32> -> vector<4x256xf32>
    %65 = vector.extract_strided_slice %2 {offsets = [6, 0], sizes = [1, 256], strides = [1, 1]} : vector<9x256xf32> to vector<1x256xf32>
    %66 = vector.broadcast %65 : vector<1x256xf32> to vector<4x256xf32>
    %67 = arith.mulf %64, %66 : vector<4x256xf32>
    %68 = vector.extract_strided_slice %30 {offsets = [0, 16], sizes = [4, 240], strides = [1, 1]} : vector<4x256xf32> to vector<4x240xf32>
    %69 = vector.extract_strided_slice %30 {offsets = [0, 0], sizes = [4, 16], strides = [1, 1]} : vector<4x256xf32> to vector<4x16xf32>
    %70 = tpu.concatenate %68, %69 in 1 : vector<4x240xf32>, vector<4x16xf32> -> vector<4x256xf32>
    %71 = vector.extract_strided_slice %2 {offsets = [7, 0], sizes = [1, 256], strides = [1, 1]} : vector<9x256xf32> to vector<1x256xf32>
    %72 = vector.broadcast %71 : vector<1x256xf32> to vector<4x256xf32>
    %73 = arith.mulf %70, %72 : vector<4x256xf32>
    %74 = vector.extract_strided_slice %30 {offsets = [0, 17], sizes = [4, 239], strides = [1, 1]} : vector<4x256xf32> to vector<4x239xf32>
    %75 = vector.extract_strided_slice %30 {offsets = [0, 0], sizes = [4, 17], strides = [1, 1]} : vector<4x256xf32> to vector<4x17xf32>
    %76 = tpu.concatenate %74, %75 in 1 : vector<4x239xf32>, vector<4x17xf32> -> vector<4x256xf32>
    %77 = vector.extract_strided_slice %2 {offsets = [8, 0], sizes = [1, 256], strides = [1, 1]} : vector<9x256xf32> to vector<1x256xf32>
    %78 = vector.broadcast %77 : vector<1x256xf32> to vector<4x256xf32>
    %79 = arith.mulf %76, %78 : vector<4x256xf32>
    %80 = tpu.concatenate %37, %43, %49, %55, %30, %61, %67, %73, %79 in 0 : vector<4x256xf32>, vector<4x256xf32>, vector<4x256xf32>, vector<4x256xf32>, vector<4x256xf32>, vector<4x256xf32>, vector<4x256xf32>, vector<4x256xf32>, vector<4x256xf32> -> vector<36x256xf32>
    %81 = arith.truncf %80 : vector<36x256xf32> to vector<36x256xbf16>
    %cst_16 = arith.constant dense<0.000000e+00> : vector<4x256xf32>
    %82 = tpu.matmul %31, %81, %cst_16 {dimension_numbers = #tpu.dot_dimension_numbers<[1], [0], [0], [1], [0, 0, 1, 1], [], []>} : vector<4x36xbf16>, vector<36x256xbf16>, vector<4x256xf32> -> vector<4x256xf32>
    %c0_17 = arith.constant 0 : index
    %c0_18 = arith.constant 0 : index
    %83 = vector.load %arg6[%c0_17, %c0_18] : memref<4x1xf32, #tpu.memory_space<vmem>>, vector<4x1xf32>
    %c0_19 = arith.constant 0 : index
    %c0_20 = arith.constant 0 : index
    %84 = vector.load %arg7[%c0_19, %c0_20] : memref<4x1xf32, #tpu.memory_space<vmem>>, vector<4x1xf32>
    %cst_21 = arith.constant dense<0.000000e+00> : vector<4xf32>
    %85 = vector.multi_reduction <add>, %82, %cst_21 [1] : vector<4x256xf32> to vector<4xf32>
    %86 = vector.shape_cast %85 : vector<4xf32> to vector<4x1xf32>
    %cst_22 = arith.constant 2.560000e+02 : f32
    %87 = vector.broadcast %cst_22 : f32 to vector<4x1xf32>
    %88 = arith.divf %86, %87 : vector<4x1xf32>
    %89 = arith.mulf %82, %82 : vector<4x256xf32>
    %cst_23 = arith.constant dense<0.000000e+00> : vector<4xf32>
    %90 = vector.multi_reduction <add>, %89, %cst_23 [1] : vector<4x256xf32> to vector<4xf32>
    %91 = vector.shape_cast %90 : vector<4xf32> to vector<4x1xf32>
    %cst_24 = arith.constant 2.560000e+02 : f32
    %92 = vector.broadcast %cst_24 : f32 to vector<4x1xf32>
    %93 = arith.divf %91, %92 : vector<4x1xf32>
    %94 = arith.mulf %88, %88 : vector<4x1xf32>
    %95 = arith.subf %93, %94 : vector<4x1xf32>
    %cst_25 = arith.constant 0.000000e+00 : f32
    %96 = vector.broadcast %cst_25 : f32 to vector<4x1xf32>
    %97 = arith.maximumf %95, %96 : vector<4x1xf32>
    %cst_26 = arith.constant 9.99999974E-6 : f32
    %98 = vector.broadcast %cst_26 : f32 to vector<4x1xf32>
    %99 = arith.addf %97, %98 : vector<4x1xf32>
    %100 = math.rsqrt %99 : vector<4x1xf32>
    %101 = vector.broadcast %88 : vector<4x1xf32> to vector<4x256xf32>
    %102 = arith.subf %82, %101 : vector<4x256xf32>
    %103 = vector.broadcast %100 : vector<4x1xf32> to vector<4x256xf32>
    %104 = arith.mulf %102, %103 : vector<4x256xf32>
    %105 = vector.broadcast %83 : vector<4x1xf32> to vector<4x256xf32>
    %106 = arith.mulf %104, %105 : vector<4x256xf32>
    %107 = vector.broadcast %84 : vector<4x1xf32> to vector<4x256xf32>
    %108 = arith.addf %106, %107 : vector<4x256xf32>
    %cst_27 = arith.constant 0.000000e+00 : f32
    %109 = vector.broadcast %cst_27 : f32 to vector<4x256xf32>
    %110 = arith.maximumf %108, %109 : vector<4x256xf32>
    %c0_28 = arith.constant 0 : index
    %c0_29 = arith.constant 0 : index
    %111 = vector.load %arg8[%c0_28, %c0_29] : memref<4x36xbf16, #tpu.memory_space<vmem>>, vector<4x36xbf16>
    %112 = vector.extract_strided_slice %110 {offsets = [0, 239], sizes = [4, 17], strides = [1, 1]} : vector<4x256xf32> to vector<4x17xf32>
    %113 = vector.extract_strided_slice %110 {offsets = [0, 0], sizes = [4, 239], strides = [1, 1]} : vector<4x256xf32> to vector<4x239xf32>
    %114 = tpu.concatenate %112, %113 in 1 : vector<4x17xf32>, vector<4x239xf32> -> vector<4x256xf32>
    %115 = vector.extract_strided_slice %2 {offsets = [0, 0], sizes = [1, 256], strides = [1, 1]} : vector<9x256xf32> to vector<1x256xf32>
    %116 = vector.broadcast %115 : vector<1x256xf32> to vector<4x256xf32>
    %117 = arith.mulf %114, %116 : vector<4x256xf32>
    %118 = vector.extract_strided_slice %110 {offsets = [0, 240], sizes = [4, 16], strides = [1, 1]} : vector<4x256xf32> to vector<4x16xf32>
    %119 = vector.extract_strided_slice %110 {offsets = [0, 0], sizes = [4, 240], strides = [1, 1]} : vector<4x256xf32> to vector<4x240xf32>
    %120 = tpu.concatenate %118, %119 in 1 : vector<4x16xf32>, vector<4x240xf32> -> vector<4x256xf32>
    %121 = vector.extract_strided_slice %2 {offsets = [1, 0], sizes = [1, 256], strides = [1, 1]} : vector<9x256xf32> to vector<1x256xf32>
    %122 = vector.broadcast %121 : vector<1x256xf32> to vector<4x256xf32>
    %123 = arith.mulf %120, %122 : vector<4x256xf32>
    %124 = vector.extract_strided_slice %110 {offsets = [0, 241], sizes = [4, 15], strides = [1, 1]} : vector<4x256xf32> to vector<4x15xf32>
    %125 = vector.extract_strided_slice %110 {offsets = [0, 0], sizes = [4, 241], strides = [1, 1]} : vector<4x256xf32> to vector<4x241xf32>
    %126 = tpu.concatenate %124, %125 in 1 : vector<4x15xf32>, vector<4x241xf32> -> vector<4x256xf32>
    %127 = vector.extract_strided_slice %2 {offsets = [2, 0], sizes = [1, 256], strides = [1, 1]} : vector<9x256xf32> to vector<1x256xf32>
    %128 = vector.broadcast %127 : vector<1x256xf32> to vector<4x256xf32>
    %129 = arith.mulf %126, %128 : vector<4x256xf32>
    %130 = vector.extract_strided_slice %110 {offsets = [0, 255], sizes = [4, 1], strides = [1, 1]} : vector<4x256xf32> to vector<4x1xf32>
    %131 = vector.extract_strided_slice %110 {offsets = [0, 0], sizes = [4, 255], strides = [1, 1]} : vector<4x256xf32> to vector<4x255xf32>
    %132 = tpu.concatenate %130, %131 in 1 : vector<4x1xf32>, vector<4x255xf32> -> vector<4x256xf32>
    %133 = vector.extract_strided_slice %2 {offsets = [3, 0], sizes = [1, 256], strides = [1, 1]} : vector<9x256xf32> to vector<1x256xf32>
    %134 = vector.broadcast %133 : vector<1x256xf32> to vector<4x256xf32>
    %135 = arith.mulf %132, %134 : vector<4x256xf32>
    %136 = vector.extract_strided_slice %110 {offsets = [0, 1], sizes = [4, 255], strides = [1, 1]} : vector<4x256xf32> to vector<4x255xf32>
    %137 = vector.extract_strided_slice %110 {offsets = [0, 0], sizes = [4, 1], strides = [1, 1]} : vector<4x256xf32> to vector<4x1xf32>
    %138 = tpu.concatenate %136, %137 in 1 : vector<4x255xf32>, vector<4x1xf32> -> vector<4x256xf32>
    %139 = vector.extract_strided_slice %2 {offsets = [5, 0], sizes = [1, 256], strides = [1, 1]} : vector<9x256xf32> to vector<1x256xf32>
    %140 = vector.broadcast %139 : vector<1x256xf32> to vector<4x256xf32>
    %141 = arith.mulf %138, %140 : vector<4x256xf32>
    %142 = vector.extract_strided_slice %110 {offsets = [0, 15], sizes = [4, 241], strides = [1, 1]} : vector<4x256xf32> to vector<4x241xf32>
    %143 = vector.extract_strided_slice %110 {offsets = [0, 0], sizes = [4, 15], strides = [1, 1]} : vector<4x256xf32> to vector<4x15xf32>
    %144 = tpu.concatenate %142, %143 in 1 : vector<4x241xf32>, vector<4x15xf32> -> vector<4x256xf32>
    %145 = vector.extract_strided_slice %2 {offsets = [6, 0], sizes = [1, 256], strides = [1, 1]} : vector<9x256xf32> to vector<1x256xf32>
    %146 = vector.broadcast %145 : vector<1x256xf32> to vector<4x256xf32>
    %147 = arith.mulf %144, %146 : vector<4x256xf32>
    %148 = vector.extract_strided_slice %110 {offsets = [0, 16], sizes = [4, 240], strides = [1, 1]} : vector<4x256xf32> to vector<4x240xf32>
    %149 = vector.extract_strided_slice %110 {offsets = [0, 0], sizes = [4, 16], strides = [1, 1]} : vector<4x256xf32> to vector<4x16xf32>
    %150 = tpu.concatenate %148, %149 in 1 : vector<4x240xf32>, vector<4x16xf32> -> vector<4x256xf32>
    %151 = vector.extract_strided_slice %2 {offsets = [7, 0], sizes = [1, 256], strides = [1, 1]} : vector<9x256xf32> to vector<1x256xf32>
    %152 = vector.broadcast %151 : vector<1x256xf32> to vector<4x256xf32>
    %153 = arith.mulf %150, %152 : vector<4x256xf32>
    %154 = vector.extract_strided_slice %110 {offsets = [0, 17], sizes = [4, 239], strides = [1, 1]} : vector<4x256xf32> to vector<4x239xf32>
    %155 = vector.extract_strided_slice %110 {offsets = [0, 0], sizes = [4, 17], strides = [1, 1]} : vector<4x256xf32> to vector<4x17xf32>
    %156 = tpu.concatenate %154, %155 in 1 : vector<4x239xf32>, vector<4x17xf32> -> vector<4x256xf32>
    %157 = vector.extract_strided_slice %2 {offsets = [8, 0], sizes = [1, 256], strides = [1, 1]} : vector<9x256xf32> to vector<1x256xf32>
    %158 = vector.broadcast %157 : vector<1x256xf32> to vector<4x256xf32>
    %159 = arith.mulf %156, %158 : vector<4x256xf32>
    %160 = tpu.concatenate %117, %123, %129, %135, %110, %141, %147, %153, %159 in 0 : vector<4x256xf32>, vector<4x256xf32>, vector<4x256xf32>, vector<4x256xf32>, vector<4x256xf32>, vector<4x256xf32>, vector<4x256xf32>, vector<4x256xf32>, vector<4x256xf32> -> vector<36x256xf32>
    %161 = arith.truncf %160 : vector<36x256xf32> to vector<36x256xbf16>
    %cst_30 = arith.constant dense<0.000000e+00> : vector<4x256xf32>
    %162 = tpu.matmul %111, %161, %cst_30 {dimension_numbers = #tpu.dot_dimension_numbers<[1], [0], [0], [1], [0, 0, 1, 1], [], []>} : vector<4x36xbf16>, vector<36x256xbf16>, vector<4x256xf32> -> vector<4x256xf32>
    %163 = arith.addf %162, %1 : vector<4x256xf32>
    %c0_31 = arith.constant 0 : index
    %c0_32 = arith.constant 0 : index
    %c0_33 = arith.constant 0 : index
    %164 = vector.load %arg9[%c0_31, %c0_32, %c0_33] : memref<1x4x256xf32, #tpu.memory_space<vmem>>, vector<1x4x256xf32>
    %165 = vector.shape_cast %164 : vector<1x4x256xf32> to vector<4x256xf32>
    %166 = vector.shape_cast %163 : vector<4x256xf32> to vector<1x4x256xf32>
    tpu.vector_store %arg9[%c0_31, %c0_32, %c0_33], %166 {strides = array<i32>} : memref<1x4x256xf32, #tpu.memory_space<vmem>>, vector<1x4x256xf32>,
    return
  }
  func.func @transform_0(%arg0: i32) -> (i32, i32, i32) {
    %c0_i32 = arith.constant 0 : i32
    %c0_i32_0 = arith.constant 0 : i32
    %c0_i32_1 = arith.constant 0 : i32
    return %arg0, %c0_i32, %c0_i32_0 : i32, i32, i32
  }
  func.func @transform_1(%arg0: i32) -> (i32, i32) {
    %c0_i32 = arith.constant 0 : i32
    %c0_i32_0 = arith.constant 0 : i32
    %c0_i32_1 = arith.constant 0 : i32
    return %c0_i32, %c0_i32_0 : i32, i32
  }
  func.func @transform_2(%arg0: i32) -> (i32, i32) {
    %c0_i32 = arith.constant 0 : i32
    %c0_i32_0 = arith.constant 0 : i32
    %c0_i32_1 = arith.constant 0 : i32
    return %c0_i32, %c0_i32_0 : i32, i32
  }
  func.func @transform_3(%arg0: i32) -> (i32, i32) {
    %c0_i32 = arith.constant 0 : i32
    %c0_i32_0 = arith.constant 0 : i32
    %c0_i32_1 = arith.constant 0 : i32
    return %c0_i32, %c0_i32_0 : i32, i32
  }
  func.func @transform_4(%arg0: i32) -> (i32, i32) {
    %c0_i32 = arith.constant 0 : i32
    %c0_i32_0 = arith.constant 0 : i32
    %c0_i32_1 = arith.constant 0 : i32
    return %c0_i32, %c0_i32_0 : i32, i32
  }
  func.func @transform_5(%arg0: i32) -> (i32, i32) {
    %c0_i32 = arith.constant 0 : i32
    %c0_i32_0 = arith.constant 0 : i32
    %c0_i32_1 = arith.constant 0 : i32
    return %c0_i32, %c0_i32_0 : i32, i32
  }
  func.func @transform_6(%arg0: i32) -> (i32, i32) {
    %c0_i32 = arith.constant 0 : i32
    %c0_i32_0 = arith.constant 0 : i32
    %c0_i32_1 = arith.constant 0 : i32
    return %c0_i32, %c0_i32_0 : i32, i32
  }
  func.func @transform_7(%arg0: i32) -> (i32, i32) {
    %c0_i32 = arith.constant 0 : i32
    %c0_i32_0 = arith.constant 0 : i32
    %c0_i32_1 = arith.constant 0 : i32
    return %c0_i32, %c0_i32_0 : i32, i32
  }
  func.func @transform_8(%arg0: i32) -> (i32, i32, i32) {
    %c0_i32 = arith.constant 0 : i32
    %c0_i32_0 = arith.constant 0 : i32
    %c0_i32_1 = arith.constant 0 : i32
    return %arg0, %c0_i32, %c0_i32_0 : i32, i32, i32
  }
}

</mosaic_0001>

<bundles_post_ra>
// kernel: tpu_custom_call.1
= control target key start
LH: loop header
LB: loop body
LE: loop exit
PB: predicated region body
PF: predicated region fallthrough
CT: control target
= control target key end

     0   :  { %13 = vsyncpa [#allocation3], 0  ;;  %s1571_s0 = inlined_call_operand.vmem [shape: f32[2,4,256], index: 0, kind: input, shape index: {}]   ;;  %s1572_s1 = inlined_call_operand.hbm [shape: f32[9,256], index: 1, kind: input, shape index: {}]   ;;  %s1573_s2 = inlined_call_operand.vmem [shape: f32[4,1], index: 2, kind: input, shape index: {}]   ;;  %s1574_s3 = inlined_call_operand.vmem [shape: f32[4,1], index: 3, kind: input, shape index: {}]   ;;  %s1575_s4 = inlined_call_operand.vmem [shape: bf16[4,36], index: 4, kind: input, shape index: {}]   ;;  %s1576_s5 = inlined_call_operand.vmem [shape: f32[4,1], index: 5, kind: input, shape index: {}]   ;;  %s1577_s6 = inlined_call_operand.vmem [shape: f32[4,1], index: 6, kind: input, shape index: {}]   ;;  %s1578_s7 = inlined_call_operand.vmem [shape: bf16[4,36], index: 7, kind: input, shape index: {}]   ;;  %s1579_s8 = inlined_call_operand.hbm [shape: f32[2,4,256], index: 8, kind: output, shape index: {}]  }
   0x1   :  { %14 = vsyncpa [#allocation4], 0 }
   0x2   :  { %16 = vsyncpa [#allocation4 + $0x1], 0  ;;  %s1207_s27 = smov 0   ;;  %s1209_s28 = smov 0  }
   0x3   :  { %s1211_s29 = smov 0   ;;  %s1213_s30 = smov 0  }
   0x4 LB: > { %s1228_s9 = sadd.s32 4294967295, %s1146_s30   ;;  %s965_s10 = sadd.s32 4294967294, %s1146_s30   ;;  %s1146_s30 = sphi %s1213_s30, %s1587_s30   ;;  %s1142_s29 = sphi %s1211_s29, %s1586_s29   ;;  %s1138_s28 = sphi %s1209_s28, %s1585_s28   ;;  %s1134_s27 = sphi %s1207_s27, %s1584_s27  }
   0x5   : > { %s1232_s11 = sadd.s32 1, %s1146_s30   ;;  %s202_s12 = sadd.s32 1, %s1142_s29 }
   0x6   : > { %s199_s13 = ssub.s32 %s1146_s30, %s1232_s11  ;;  %p212_p0 = scmp.ne.s32.totalorder %s1142_s29, %s1138_s28 }
   0x7   : > { %p200_p1 = scmp.eq.s32.totalorder %s199_s13, 0  ;;  %p213_p2 = scmp.eq.s32.totalorder %s1228_s9, 1 }
   0x8   : > { %p218_p3 = scmp.ne.s32.totalorder %s1138_s28, %s1134_s27  ;;  %p219_p4 = scmp.eq.s32.totalorder %s965_s10, 1 }
   0x9   : > { %s1243_s14 = scalar_select %p200_p1, %s1142_s29, %s202_s12  }
   0xa   : > { %p1245_p5 = por %p213_p2, %p212_p0  ;;  %p1249_p6 = por %p219_p4, %p218_p3 }
   0xb   : > { %p966_p7 = scmp.ge.s32.totalorder %s1146_s30, 1  ;;  %p226_p8 = scmp.lt.s32.totalorder %s1146_s30, 3 }
   0xc   : > { %s1581_s16 = scalar_select %p1249_p6, 1, 0 }
   0xd   : > { %p1001_p9 = scmp.eq.s32.totalorder %s1228_s9, 0  ;;  %p1256_p10 = pnand %p966_p7, %p226_p8 }
   0xe   : > { %s1148_s18 = smov [#allocation2]  }
   0xf   : > { %s238_s19 = sshll.u32 %s1148_s18, 4  ;;  %p993_p11 = pneg %p1256_p10  ;;  %s239_s19 = int_to_ptr.vmem [resolvable:$true] %s238_s19 }
  0x10   : > { %s1067_s20 = scalar_lea.vmem %s239_s19, 512  ;;  %p1075_p3 = scmp.lt.s32.totalorder %s239_s19, %s239_s19 }
  0x11   : > { %p994_p12 = pnand %p1001_p9, %p993_p11  ;;  %p1068_p0 = scmp.ne.s32.totalorder %s239_s19, %s1067_s20 }
  0x12   : > { %p1076_p4 = scmp.lt.s32.totalorder %s1067_s20, %s1067_s20 }
  0x13   : > { %p1058_p13 = pneg %p994_p12 }
  0x14   : > { %p1077_p6 = por %p1076_p4, %p1075_p3 }
  0x15   : > { %p1070_p1 = pnand %p1068_p0, %p1058_p13 }
  0x17   : > { %p1071_p2 = pneg %p1070_p1 }
  0x19   : > { %p1078_p7 = pnand %p1077_p6, %p1071_p2 }
  0x1b   : > { %1081 = shalt.err (!%p1078_p7)
}
  0x1c   : > { %s1149_s21 = smov 256   ;;  %s1150_s22 = smov 16  }
  0x1d   : > { %996 = dma.hbm_to_vmem [thread:$0]  (!%p994_p12), %s1572_s1, 512, %s239_s19, [#allocation3], %s1149_s21, %s1149_s21, %s1150_s22  }
  0x1e   : > { %280 = sbr.rel (%p1256_p10) target bundleno = 1128 (0x468), region = 52 }
  0x23   : > { %1125 = dma.done.wait (%p1001_p9), [#allocation3], 512  }
  0x24   : > { %1127 = vsyncadd (%p1001_p9), [#allocation3], 4294966784  ;;  %p314_p8 = scmp.lt.s32.totalorder %s1228_s9, 1  ;;  %v1151_v0 = vmov 0   ;;  %vm330_vm0 = vcmask 1043456   ;;  %v357_v22 = vlaneseq  ;;  %s1153_s21 = smov 127  }
  0x25   : > { %1049 = vset.pattern.permute.xlu1 %v1151_v0  ;;  %645 = vmatprep.mubr.bf16.mxu0 %v1151_v0  ;;  %v325_v2 = vld [vmem:[%s1573_s2] sm:$0xf]  ;;  %v1152_v20 = vmov 839922192   ;;  %s1154_s22 = smov 111   ;;  %s1155_s23 = smov 112  }
  0x26   : > { %s315_s25 = scalar_select %p314_p8, %s1228_s9, 1  ;;  %1050 = vset.pattern.permute.xlu0 %v1151_v0  ;;  %865 = vmatprep.mubr.bf16.mxu1 %v1151_v0  ;;  %v326_v6 = vld [vmem:[%s1574_s3] sm:$0xf]  ;;  %v355_v21 = vunpack.c.l.s4 %v1152_v20  ;;  %v1298_v25 = vshrl.u32 %v357_v22, 7  ;;  %vm547_vm1 = vcmask 908288   ;;  %v1349_v49 = vld [vmem:[#allocation2 + $0x8] sm:$0xff] }
  0x27   : > { %375 = vperm.xlu1 %1049, %v325_v2   ;;  %s1156_s24 = smov 16   ;;  %s1159_s10 = smov 17   ;;  %v1345_v47 = vld [vmem:[#allocation2] sm:$0xff]  ;;  %v1347_v48 = vld [vmem:[#allocation2 + $0x10] ss:$0 sm:$0xff]  ;;  %vm487_vm2 = vcmask 1039360  }
  0x28   : > { %s985_s26 = sshll.u32 %s315_s25, 3  ;;  %v356_v24 = vunpack.c.0.s8 %v355_v21  ;;  %s1157_s25 = smov 113   ;;  %v495_v46 = vsub.s32 5, %v1298_v25  ;;  %v1351_v50 = vld [vmem:[#allocation2 + $0x18] ss:$0 sm:$0xff]  ;;  %v535_v59 = vsub.s32 7, %v1298_v25 }
  0x29   : > { %s318_s13 = scalar_lea.vmem %s1571_s0, %s985_s26  ;;  %s1158_s26 = smov 1   ;;  %vm606_vm3 = vcmask 1041408   ;;  %v515_v60 = vsub.s32 6, %v1298_v25  ;;  %vm507_vm4 = vcmask 924672   ;;  %vm527_vm5 = vcmask 916480  }
  0x2a   : > { %v1278_v1 = vld [vmem:[%s318_s13] sm:$0xff]  ;;  %v359_v26 = vsub.s32 %v356_v24, %v1298_v25  ;;  %s1160_s12 = smov 15   ;;  %v1358_v55 = vrot.slane %v1345_v47, %v495_v46  ;;  %v1362_v57 = vrot.slane %v1349_v49, %v495_v46  ;;  %vm428_vm6 = vcmask 130048  }
  0x2b   : > { %v1285_v3 = vcombine.high %v1278_v1, %v1278_v1  ;;  %v331_v4 = vsel %vm330_vm0, %v1278_v1, 0.0  ;;  %v338_v5 = vmul.f32 %v1278_v1, %v1278_v1  ;;  %388 = vperm.xlu1 %1049, %v326_v6   ;;  %vm468_vm7 = vcmask 7168  }
  0x2c   : > { %vm408_vm8 = vcmask 138240   ;;  %vm448_vm9 = vcmask 121856   ;;  %vm602_vm10 = vcmask 293888  }
  0x2d   : > { %v332_v7 = vsel %vm330_vm0, %v1285_v3, 0.0  ;;  %v340_v8 = vcombine.high %v338_v5, %v338_v5  ;;  %v342_v9 = vsel %vm330_vm0, %v338_v5, 0.0 }
  0x2e   : > { %v333_v10 = vadd.f32 %v332_v7, %v331_v4  ;;  %v1373_v7 = vrot.slane %v1345_v47, %v535_v59 }
  0x2f   : > { %v343_v11 = vsel %vm330_vm0, %v340_v8, 0.0  ;;  %v1376_v8 = vrot.slane %v1349_v49, %v535_v59 }
  0x30   : > { %334 = vadd.xlane.f32.xlu0 %v333_v10  ;;  %v344_v12 = vadd.f32 %v343_v11, %v342_v9  ;;  %v1380_v10 = vrot.slane %v1345_v47, %v515_v60  ;;  %v1383_v11 = vrot.slane %v1349_v49, %v515_v60 }
  0x34   : > { %345 = vadd.xlane.f32.xlu0 %v344_v12 }
  0xa2   : > { %v376_v27 = vpop.permute.xlu1 %375 }
  0xa3   : > { %v383_v34 = vrot.slane %v376_v27, %v359_v26  ;;  %v435_v27 = vsub.s32 1, %v1298_v25 }
  0xa6   : > { %v389_v32 = vpop.permute.xlu1 %388 }
  0xa7   : > { %v396_v36 = vrot.slane %v389_v32, %v359_v26 }
  0xb9   : > { %v335_v13 = vpop.xlane.xlu0 %334 }
  0xba   : > { %v337_v14 = vmul.f32 0.00390625, %v335_v13 }
  0xbc   : > { %v348_v16 = vmul.f32 %v337_v14, %v337_v14  ;;  %v360_v28 = vrot.slane %v337_v14, %v359_v26 }
  0xbd   : > { %v346_v15 = vpop.xlane.xlu0 %345 }
  0xbe   : > { %v347_v17 = vmul.f32 0.00390625, %v346_v15  ;;  %v362_v30 = vsub.f32 %v1278_v1, %v360_v28  ;;  %v475_v28 = vsub.s32 3, %v1298_v25 }
  0xc0   : > { %v349_v18 = vsub.f32 %v347_v17, %v348_v16 }
  0xc2   : > { %v350_v19 = vmax.f32 %v349_v18, 0.0 }
  0xc4   : > { %v351_v23 = vadd.f32 1e-05, %v350_v19 }
  0xc6   : > { %1052 = vrsqrt.f32 %v351_v23 }
  0xd3   : > { %v1053_v29 = vpop.eup %1052 }
  0xd4   : > { %v370_v31 = vrot.slane %v1053_v29, %v359_v26 }
  0xd6   : > { %v372_v33 = vmul.f32 %v370_v31, %v362_v30 }
  0xd8   : > { %v385_v35 = vmul.f32 %v383_v34, %v372_v33 }
  0xda   : > { %v398_v37 = vadd.f32 %v396_v36, %v385_v35  ;;  %v415_v36 = vsub.s32 0, %v1298_v25 }
  0xdc   : > { %v1302_v38 = vmax.f32 %v398_v37, 0.0  ;;  %v1403_v37 = vrot.slane %v1345_v47, %v435_v27 }
  0xde   : > { %483 = vrot.lane.b32.xlu1 %v1302_v38, %s1153_s21  ;;  %543 = vrot.lane.b32.xlu0 %v1302_v38, %s1154_s22  ;;  %v1318_v39 = vcombine.high %v1302_v38, %v1302_v38 }
  0xe2   : > { %523 = vrot.lane.b32.xlu1 %v1302_v38, %s1155_s23  ;;  %426 = vrot.lane.b32.xlu0 %v1302_v38, %s1156_s24 }
  0xe6   : > { %503 = vrot.lane.b32.xlu1 %v1302_v38, %s1157_s25  ;;  %466 = vrot.lane.b32.xlu0 %v1302_v38, %s1158_s26 }
  0xea   : > { %406 = vrot.lane.b32.xlu0 %v1302_v38, %s1159_s10  ;;  %545 = vrot.lane.b32.xlu1 %v1318_v39, %s1154_s22 }
  0xee   : > { %505 = vrot.lane.b32.xlu0 %v1318_v39, %s1157_s25  ;;  %485 = vrot.lane.b32.xlu1 %v1318_v39, %s1153_s21 }
  0xf2   : > { %446 = vrot.lane.b32.xlu0 %v1302_v38, %s1160_s12  ;;  %525 = vrot.lane.b32.xlu1 %v1318_v39, %s1155_s23 }
  0xf6   : > { %423 = vrot.lane.b32.xlu1 %v1318_v39, %s1156_s24 }
  0xfa   : > { %463 = vrot.lane.b32.xlu1 %v1318_v39, %s1158_s26 }
  0xfe   : > { %403 = vrot.lane.b32.xlu1 %v1318_v39, %s1159_s10 }
 0x102   : > { %443 = vrot.lane.b32.xlu1 %v1318_v39, %s1160_s12 }
 0x150   : > { %v484_v40 = vpop.permute.xlu1 %483  ;;  %v544_v41 = vpop.permute.xlu0 %543 }
 0x154   : > { %v524_v42 = vpop.permute.xlu1 %523  ;;  %v1340_v43 = vpop.permute.xlu0 %426 }
 0x158   : > { %v504_v44 = vpop.permute.xlu1 %503  ;;  %v1342_v45 = vpop.permute.xlu0 %466 }
 0x15c   : > { %v1353_v51 = vpop.permute.xlu0 %406  ;;  %v546_v52 = vpop.permute.xlu1 %545 }
 0x15d   : > { %v548_v53 = vsel %vm547_vm1, %v544_v41, %v546_v52  ;;  %v552_v54 = vsel %vm547_vm1, %v546_v52, %v544_v41 }
 0x15e   : > { %v561_v56 = vmul.f32 %v1347_v48, %v548_v53  ;;  %v562_v58 = vmul.f32 %v1351_v50, %v552_v54  ;;  %v1424_v53 = vrot.slane %v1345_v47, %v415_v36  ;;  %v1427_v54 = vrot.slane %v1349_v49, %v415_v36 }
 0x160   : > { %v486_v61 = vpop.permute.xlu1 %485  ;;  %v601_v62 = vpack.c.bf16 %v562_v58, %v562_v58  ;;  %v600_v63 = vpack.c.bf16 %v561_v56, %v561_v56  ;;  %v506_v4 = vpop.permute.xlu0 %505 }
 0x161   : > { %v488_v0 = vsel %vm487_vm2, %v484_v40, %v486_v61  ;;  %v492_v2 = vsel %vm487_vm2, %v486_v61, %v484_v40  ;;  %v508_v13 = vsel %vm507_vm4, %v504_v44, %v506_v4  ;;  %v512_v14 = vsel %vm507_vm4, %v506_v4, %v504_v44 }
 0x162   : > { %v501_v5 = vmul.f32 %v1358_v55, %v488_v0  ;;  %v502_v6 = vmul.f32 %v1362_v57, %v492_v2  ;;  %976 = vmatprep.subr.msk.bf16.mxu0 %vm606_vm3, %v601_v62  ;;  %v608_v9 = vsel %vm606_vm3, %v600_v63, 0  ;;  %v521_v21 = vmul.f32 %v1380_v10, %v508_v13 }
 0x163   : > { %624 = vmatpush1.bf16.msra.mxu0 %v608_v9  ;;  %v522_v22 = vmul.f32 %v1383_v11, %v512_v14  ;;  %v1406_v40 = vrot.slane %v1349_v49, %v435_v27  ;;  %v455_v44 = vsub.s32 2, %v1298_v25 }
 0x164   : > { %v526_v12 = vpop.permute.xlu1 %525  ;;  %v578_v17 = vrot.slane %v501_v5, 4  ;;  %v579_v18 = vrot.slane %v502_v6, 4  ;;  %v447_v63 = vpop.permute.xlu0 %446 }
 0x165   : > { %v528_v15 = vsel %vm527_vm5, %v524_v42, %v526_v12  ;;  %v532_v16 = vsel %vm527_vm5, %v526_v12, %v524_v42  ;;  %v1438_v61 = vrot.slane %v1345_v47, %v455_v44  ;;  %v1441_v62 = vrot.slane %v1349_v49, %v455_v44 }
 0x166   : > { %v541_v19 = vmul.f32 %v1373_v7, %v528_v15  ;;  %v542_v20 = vmul.f32 %v1376_v8, %v532_v16  ;;  %v593_v29 = vsel %vm330_vm0, %v1318_v39, %v579_v18  ;;  %v592_v31 = vsel %vm330_vm0, %v1302_v38, %v578_v17 }
 0x167   : > { %v1409_v39 = vrot.slane %v1345_v47, %v475_v28  ;;  %v1412_v38 = vrot.slane %v1349_v49, %v475_v28 }
 0x168   : > { %v584_v23 = vrot.slane %v541_v19, 4  ;;  %v585_v24 = vrot.slane %v542_v20, 4  ;;  %v424_v26 = vpop.permute.xlu1 %423  ;;  %v400_v20 = vld [vmem:[%s1575_s4] sm:$0x3] }
 0x169   : > { %v429_v41 = vsel %vm428_vm6, %v1340_v43, %v424_v26  ;;  %v432_v42 = vsel %vm428_vm6, %v424_v26, %v1340_v43 }
 0x16a   : > { %v595_v30 = vsel %vm330_vm0, %v522_v22, %v585_v24  ;;  %v594_v32 = vsel %vm330_vm0, %v521_v21, %v584_v23  ;;  %v441_v43 = vmul.f32 %v1403_v37, %v432_v42  ;;  %v442_v58 = vmul.f32 %v1406_v40, %v429_v41 }
 0x16b   : > { %v599_v33 = vpack.c.bf16 %v595_v30, %v593_v29  ;;  %v598_v34 = vpack.c.bf16 %v594_v32, %v592_v31 }
 0x16c   : > { %v464_v35 = vpop.permute.xlu1 %463  ;;  %v565_v5 = vrot.slane %v441_v43, 4  ;;  %v566_v6 = vrot.slane %v442_v58, 4 }
 0x16d   : > { %625 = vmatprep.subr.bf16.mxu0 %v599_v33  ;;  %v469_v46 = vsel %vm468_vm7, %v1342_v45, %v464_v35  ;;  %v472_v52 = vsel %vm468_vm7, %v464_v35, %v1342_v45  ;;  %v654_v35 = vld [vmem:[%s1576_s5] sm:$0xf] }
 0x16e   : > { %626 = vmatpush1.bf16.msra.mxu0 %v598_v34  ;;  %v481_v45 = vmul.f32 %v1409_v39, %v472_v52  ;;  %v482_v60 = vmul.f32 %v1412_v38, %v469_v46  ;;  %v655_v34 = vld [vmem:[%s1577_s6] sm:$0xf] }
 0x170   : > { %v404_v56 = vpop.permute.xlu1 %403  ;;  %v571_v12 = vrot.slane %v481_v45, 4  ;;  %v572_v13 = vrot.slane %v482_v60, 4 }
 0x171   : > { %v409_v25 = vsel %vm408_vm8, %v1353_v51, %v404_v56  ;;  %v412_v59 = vsel %vm408_vm8, %v404_v56, %v1353_v51 }
 0x172   : > { %v421_v0 = vmul.f32 %v1424_v53, %v412_v59  ;;  %v422_v2 = vmul.f32 %v1427_v54, %v409_v25 }
 0x174   : > { %v444_v4 = vpop.permute.xlu1 %443  ;;  %v589_v49 = vsel %vm330_vm0, %v422_v2, %v566_v6  ;;  %v588_v16 = vsel %vm330_vm0, %v421_v0, %v565_v5 }
 0x175   : > { %v449_v51 = vsel %vm448_vm9, %v447_v63, %v444_v4  ;;  %v452_v9 = vsel %vm448_vm9, %v444_v4, %v447_v63 }
 0x176   : > { %v461_v47 = vmul.f32 %v1438_v61, %v452_v9  ;;  %v462_v14 = vmul.f32 %v1441_v62, %v449_v51 }
 0x178   : > { %v591_v15 = vsel %vm330_vm0, %v462_v14, %v572_v13  ;;  %v590_v17 = vsel %vm330_vm0, %v461_v47, %v571_v12 }
 0x179   : > { %v597_v18 = vpack.c.bf16 %v591_v15, %v589_v49  ;;  %v596_v19 = vpack.c.bf16 %v590_v17, %v588_v16 }
 0x17b   : > { %627 = vmatprep.subr.bf16.mxu0 %v597_v18 }
 0x17c   : > { %628 = vmatpush1.bf16.msra.mxu0 %v596_v19 }
 0x17f   : > { %977 = vmatmul.mubr.msk.bf16.vlgmr.msra.gmra.mxu0 %vm602_vm10, %v400_v20 }
 0x23f   : > { %v647_v21 = vpop.f32.mrf.mxu0 }
 0x240   : > { %v662_v22 = vmul.f32 %v647_v21, %v647_v21  ;;  %v656_v26 = vsel %vm330_vm0, %v647_v21, 0.0 }
 0x241   : > { %v649_v23 = vpop.f32.mrf.mxu0 }
 0x242   : > { %v663_v24 = vmul.f32 %v649_v23, %v649_v23  ;;  %v657_v27 = vsel %vm330_vm0, %v649_v23, 0.0  ;;  %v664_v30 = vsel %vm330_vm0, %v662_v22, 0.0 }
 0x243   : > { %v651_v28 = vpop.f32.mrf.mxu0  ;;  %v658_v29 = vadd.f32 %v657_v27, %v656_v26 }
 0x244   : > { %v665_v31 = vsel %vm330_vm0, %v663_v24, 0.0 }
 0x245   : > { %659 = vadd.xlane.f32.xlu1 %v658_v29  ;;  %v652_v32 = vpop.f32.mrf.mxu0  ;;  %v666_v33 = vadd.f32 %v665_v31, %v664_v30 }
 0x247   : > { %667 = vadd.xlane.f32.xlu0 %v666_v33 }
 0x256   : > { %688 = vperm.xlu1 %1049, %v655_v34  }
 0x25d   : > { %681 = vperm.xlu0 %1050, %v654_v35  }
 0x2ce   : > { %v660_v36 = vpop.xlane.xlu1 %659 }
 0x2cf   : > { %v661_v41 = vmul.f32 0.00390625, %v660_v36 }
 0x2d0   : > { %v668_v42 = vpop.xlane.xlu0 %667 }
 0x2d1   : > { %v669_v44 = vmul.f32 0.00390625, %v668_v42  ;;  %v670_v46 = vmul.f32 %v661_v41, %v661_v41  ;;  %v675_v58 = vsub.f32 %v647_v21, %v661_v41  ;;  %v676_v25 = vsub.f32 %v649_v23, %v661_v41 }
 0x2d2   : > { %v689_v4 = vpop.permute.xlu1 %688 }
 0x2d3   : > { %v671_v52 = vsub.f32 %v669_v44, %v670_v46 }
 0x2d5   : > { %v672_v56 = vmax.f32 %v671_v52, 0.0 }
 0x2d7   : > { %v673_v43 = vadd.f32 1e-05, %v672_v56 }
 0x2d8   : > { %v682_v45 = vpop.permute.xlu0 %681 }
 0x2d9   : > { %1054 = vrsqrt.f32 %v673_v43 }
 0x2e6   : > { %v1055_v59 = vpop.eup %1054 }
 0x2e7   : > { %v677_v60 = vmul.f32 %v1055_v59, %v675_v58  ;;  %v678_v63 = vmul.f32 %v1055_v59, %v676_v25 }
 0x2e9   : > { %v684_v0 = vmul.f32 %v682_v45, %v677_v60  ;;  %v685_v2 = vmul.f32 %v682_v45, %v678_v63 }
 0x2eb   : > { %v691_v5 = vadd.f32 %v689_v4, %v684_v0  ;;  %v692_v6 = vadd.f32 %v689_v4, %v685_v2 }
 0x2ed   : > { %v693_v51 = vmax.f32 %v691_v5, 0.0  ;;  %v694_v9 = vmax.f32 %v692_v6, 0.0 }
 0x2ef   : > { %753 = vrot.lane.b32.xlu0 %v693_v51, %s1157_s25  ;;  %775 = vrot.lane.b32.xlu1 %v693_v51, %s1154_s22 }
 0x2f3   : > { %709 = vrot.lane.b32.xlu0 %v694_v9, %s1156_s24  ;;  %777 = vrot.lane.b32.xlu1 %v694_v9, %s1154_s22 }
 0x2f7   : > { %731 = vrot.lane.b32.xlu0 %v694_v9, %s1158_s26  ;;  %742 = vrot.lane.b32.xlu1 %v693_v51, %s1153_s21 }
 0x2fb   : > { %697 = vrot.lane.b32.xlu0 %v694_v9, %s1159_s10  ;;  %744 = vrot.lane.b32.xlu1 %v694_v9, %s1153_s21 }
 0x2ff   : > { %720 = vrot.lane.b32.xlu0 %v694_v9, %s1160_s12  ;;  %764 = vrot.lane.b32.xlu1 %v693_v51, %s1155_s23 }
 0x303   : > { %766 = vrot.lane.b32.xlu1 %v694_v9, %s1155_s23  ;;  %s311_s23 = sand.u32 1, %s1138_s28  }
 0x304   : > { %s880_s19 = scalar_lea.sflag [#allocation4], %s311_s23 }
 0x307   : > { %755 = vrot.lane.b32.xlu1 %v694_v9, %s1157_s25  ;;  %s986_s25 = sshll.u32 %s1228_s9, 7  ;;  %s1161_s9 = smov [#allocation5]  }
 0x308   : > { %s1536_s18 = scalar_lea.hbm %s1579_s8, %s986_s25  ;;  %s1086_s13 = sshll.u32 %s1161_s9, 4  ;;  %s1087_s13 = int_to_ptr.vmem [resolvable:$false] %s1086_s13 }
 0x309   : > { %s1088_s21 = scalar_lea.vmem %s1087_s13, 256 }
 0x30b   : > { %712 = vrot.lane.b32.xlu1 %v693_v51, %s1156_s24  ;;  %s971_s24 = sshll.u32 %s311_s23, 3 }
 0x30f   : > { %734 = vrot.lane.b32.xlu1 %v693_v51, %s1158_s26  ;;  %s313_s26 = scalar_lea.vmem [#allocation5], %s971_s24 }
 0x313   : > { %701 = vrot.lane.b32.xlu1 %v693_v51, %s1159_s10  ;;  %s894_s10 = sshll.u32 %s313_s26, 4  ;;  %s895_s10 = int_to_ptr.vmem [resolvable:$true] %s894_s10 }
 0x314   : > { %s1082_s20 = scalar_lea.vmem %s895_s10, 128  ;;  %p1089_p11 = scmp.lt.s32.totalorder %s895_s10, %s1087_s13 }
 0x315   : > { %p1083_p6 = scmp.ne.s32.totalorder %s895_s10, %s1082_s20  ;;  %p1090_p12 = scmp.lt.s32.totalorder %s1088_s21, %s1082_s20 }
 0x317   : > { %723 = vrot.lane.b32.xlu1 %v693_v51, %s1160_s12  ;;  %p1084_p9 = pnand %p1083_p6, %p1245_p5  ;;  %p1091_p13 = por %p1090_p12, %p1089_p11 }
 0x319   : > { %p1085_p10 = pneg %p1084_p9 }
 0x31b   : > { %p1092_p0 = pnand %p1091_p13, %p1085_p10 }
 0x361   : > { %v776_v12 = vpop.permute.xlu1 %775  ;;  %v754_v21 = vpop.permute.xlu0 %753 }
 0x365   : > { %v778_v13 = vpop.permute.xlu1 %777  ;;  %v710_v29 = vpop.permute.xlu0 %709 }
 0x366   : > { %v779_v47 = vsel %vm547_vm1, %v776_v12, %v778_v13  ;;  %v783_v14 = vsel %vm547_vm1, %v778_v13, %v776_v12 }
 0x367   : > { %v784_v49 = vmul.f32 %v1347_v48, %v779_v47  ;;  %v785_v15 = vmul.f32 %v1351_v50, %v783_v14 }
 0x369   : > { %v743_v16 = vpop.permute.xlu1 %742  ;;  %v823_v17 = vpack.c.bf16 %v785_v15, %v785_v15  ;;  %v822_v18 = vpack.c.bf16 %v784_v49, %v784_v49  ;;  %v732_v44 = vpop.permute.xlu0 %731 }
 0x36b   : > { %978 = vmatprep.subr.msk.bf16.mxu1 %vm606_vm3, %v823_v17  ;;  %v828_v19 = vsel %vm606_vm3, %v822_v18, 0 }
 0x36c   : > { %844 = vmatpush1.bf16.msra.mxu1 %v828_v19 }
 0x36d   : > { %v745_v20 = vpop.permute.xlu1 %744  ;;  %v698_v59 = vpop.permute.xlu0 %697 }
 0x36e   : > { %v746_v23 = vsel %vm487_vm2, %v743_v16, %v745_v20  ;;  %v750_v24 = vsel %vm487_vm2, %v745_v20, %v743_v16 }
 0x36f   : > { %v751_v26 = vmul.f32 %v746_v23, %v1358_v55  ;;  %v752_v48 = vmul.f32 %v750_v24, %v1362_v57 }
 0x371   : > { %v765_v22 = vpop.permute.xlu1 %764  ;;  %v800_v32 = vrot.slane %v751_v26, 4  ;;  %v801_v33 = vrot.slane %v752_v48, 4 }
 0x373   : > { %v815_v52 = vsel %vm330_vm0, %v694_v9, %v801_v33  ;;  %v721_v9 = vpop.permute.xlu0 %720 }
 0x375   : > { %v767_v50 = vpop.permute.xlu1 %766 }
 0x376   : > { %v768_v27 = vsel %vm527_vm5, %v765_v22, %v767_v50  ;;  %v772_v28 = vsel %vm527_vm5, %v767_v50, %v765_v22 }
 0x377   : > { %v773_v30 = vmul.f32 %v768_v27, %v1373_v7  ;;  %v774_v31 = vmul.f32 %v772_v28, %v1376_v8  ;;  %v814_v8 = vsel %vm330_vm0, %v693_v51, %v800_v32 }
 0x379   : > { %v756_v34 = vpop.permute.xlu1 %755  ;;  %v806_v55 = vrot.slane %v773_v30, 4  ;;  %v807_v41 = vrot.slane %v774_v31, 4 }
 0x37a   : > { %v757_v35 = vsel %vm507_vm4, %v754_v21, %v756_v34  ;;  %v761_v36 = vsel %vm507_vm4, %v756_v34, %v754_v21  ;;  %v695_v21 = vld [vmem:[%s1578_s7] sm:$0x3] }
 0x37b   : > { %v762_v57 = vmul.f32 %v757_v35, %v1380_v10  ;;  %v763_v42 = vmul.f32 %v761_v36, %v1383_v11 }
 0x37d   : > { %v713_v46 = vpop.permute.xlu1 %712  ;;  %v817_v7 = vsel %vm330_vm0, %v763_v42, %v807_v41  ;;  %v816_v56 = vsel %vm330_vm0, %v762_v57, %v806_v55 }
 0x37e   : > { %v821_v43 = vpack.c.bf16 %v817_v7, %v815_v52  ;;  %v820_v58 = vpack.c.bf16 %v816_v56, %v814_v8  ;;  %v714_v10 = vsel %vm428_vm6, %v713_v46, %v710_v29  ;;  %v717_v11 = vsel %vm428_vm6, %v710_v29, %v713_v46 }
 0x37f   : > { %v718_v0 = vmul.f32 %v717_v11, %v1403_v37  ;;  %v719_v2 = vmul.f32 %v714_v10, %v1406_v40 }
 0x380   : > { %845 = vmatprep.subr.bf16.mxu1 %v821_v43 }
 0x381   : > { %846 = vmatpush1.bf16.msra.mxu1 %v820_v58  ;;  %v735_v25 = vpop.permute.xlu1 %734  ;;  %v788_v14 = vrot.slane %v718_v0, 4  ;;  %v789_v49 = vrot.slane %v719_v2, 4 }
 0x382   : > { %v736_v45 = vsel %vm468_vm7, %v735_v25, %v732_v44  ;;  %v739_v60 = vsel %vm468_vm7, %v732_v44, %v735_v25 }
 0x383   : > { %v740_v6 = vmul.f32 %v739_v60, %v1409_v39  ;;  %v741_v51 = vmul.f32 %v736_v45, %v1412_v38 }
 0x385   : > { %v702_v63 = vpop.permute.xlu1 %701  ;;  %v794_v15 = vrot.slane %v740_v6, 4  ;;  %v795_v16 = vrot.slane %v741_v51, 4 }
 0x386   : > { %v703_v4 = vsel %vm408_vm8, %v702_v63, %v698_v59  ;;  %v706_v5 = vsel %vm408_vm8, %v698_v59, %v702_v63 }
 0x387   : > { %v707_v12 = vmul.f32 %v706_v5, %v1424_v53  ;;  %v708_v13 = vmul.f32 %v703_v4, %v1427_v54 }
 0x389   : > { %v724_v47 = vpop.permute.xlu1 %723  ;;  %v811_v38 = vsel %vm330_vm0, %v708_v13, %v789_v49  ;;  %v810_v54 = vsel %vm330_vm0, %v707_v12, %v788_v14 }
 0x38a   : > { %v725_v37 = vsel %vm448_vm9, %v724_v47, %v721_v9  ;;  %v728_v40 = vsel %vm448_vm9, %v721_v9, %v724_v47 }
 0x38b   : > { %v729_v17 = vmul.f32 %v728_v40, %v1438_v61  ;;  %v730_v39 = vmul.f32 %v725_v37, %v1441_v62 }
 0x38d   : > { %v813_v53 = vsel %vm330_vm0, %v730_v39, %v795_v16  ;;  %v812_v18 = vsel %vm330_vm0, %v729_v17, %v794_v15 }
 0x38e   : > { %v819_v19 = vpack.c.bf16 %v813_v53, %v811_v38  ;;  %v818_v20 = vpack.c.bf16 %v812_v18, %v810_v54 }
 0x390   : > { %847 = vmatprep.subr.bf16.mxu1 %v819_v19 }
 0x391   : > { %848 = vmatpush1.bf16.msra.mxu1 %v818_v20 }
 0x394   : > { %979 = vmatmul.mubr.msk.bf16.vlgmr.msra.gmra.mxu1 %vm602_vm10, %v695_v21 }
 0x454   : > { %v867_v61 = vpop.f32.mrf.mxu1 }
 0x455   : > { %v868_v22 = vadd.f32 %v867_v61, %v1278_v1 }
 0x456   : > { %v869_v62 = vpop.f32.mrf.mxu1 }
 0x457   : > { %v870_v23 = vadd.f32 %v869_v62, %v1285_v3 }
 0x458   : > { %v871_v24 = vpop.f32.mrf.mxu1 }
 0x459   : > { %v876_v26 = vcombine.low %v868_v22, %v870_v23 }
 0x45a   : > { %v872_v48 = vpop.f32.mrf.mxu1 }
 0x45b   : > { %878 = vst [vmem:[%s313_s26] sm:$0xff] %v876_v26 }
 0x45c   : > { %1095 = shalt.err (!%p1092_p0)
}
 0x45d   : > { %s1096_s22 = scalar_lea.hbm %s1536_s18, 128  ;;  %s1100_s25 = scalar_lea.hbm %s1579_s8, 256 }
 0x45e   : > { %p1097_p1 = scmp.ne.s32.totalorder %s1536_s18, %s1096_s22  ;;  %p1101_p4 = scmp.lt.s32.totalorder %s1536_s18, %s1579_s8 }
 0x45f   : > { %p1102_p7 = scmp.lt.s32.totalorder %s1100_s25, %s1096_s22 }
 0x460   : > { %p1098_p2 = pnand %p1097_p1, %p1245_p5 }
 0x461   : > { %p1103_p8 = por %p1102_p7, %p1101_p4 }
 0x462   : > { %p1099_p3 = pneg %p1098_p2 }
 0x464   : > { %p1104_p6 = pnand %p1103_p8, %p1099_p3 }
 0x466   : > { %1107 = shalt.err (!%p1104_p6)
}
 0x467   : > { %991 = dma.vmem_to_hbm [thread:$0]  (%p1245_p5), %s895_s10, 128, %s1536_s18, %s880_s19  }
 0x468 PF: > { %p1003_p9 = scmp.ge.s32.totalorder %s1146_s30, 2  ;;  %s906_s17 = sand.u32 1, %s1134_s27  }
 0x469   : > { %p1583_p10 = scmp.ne.s32.totalorder %s1581_s16, 0  ;;  %s907_s20 = scalar_lea.sflag [#allocation4], %s906_s17 }
 0x46b   : > { %p998_p11 = pnand %p1003_p9, %p1583_p10 }
 0x46d   : > { %p999_p12 = pneg %p998_p11 }
 0x46f   : > { %1129 = dma.done.wait (%p999_p12), %s907_s20, 128  }
 0x470   : > { %1131 = vsyncadd (%p999_p12), %s907_s20, 4294967168  ;;  %p19_p13 = scmp.ge.s32.totalorder %s1232_s11, 4   ;;  %s1584_s27 = smov %s1138_s28 }
 0x471   : > { %s1585_s28 = smov %s1142_s29  ;;  %s1586_s29 = smov %s1243_s14 }
 0x472   : > { %s1587_s30 = smov %s1232_s11  ;;  %21 = sbr.rel (!%p19_p13) target bundleno = 4 (0x4), region = 92 }
 0x477   :  { %912 = vsyncpa [#allocation3], 1 }
 0x478   :  { %914 = vsyncpa [#allocation3 + $0x1], 1 }
 0x479   :  { %915 = vsyncpa [#allocation4], 1 }
 0x47a   :  { %917 = vsyncpa [#allocation4 + $0x1], 1 }

</bundles_post_ra>
